<compile_context>
chip_gen: v7x
topology: tpu7x:2x2x1
jax: 0.10.0
libtpu: 0.0.40
codegen_flags: <defaults>
</compile_context>

<pallas_src>
import functools
import math

import jax
import jax.numpy as jnp
from jax.experimental import pallas as pl
from jax.experimental.pallas import tpu as pltpu

_MIB = 1024 * 1024


def _query_tpu():
    """Best-effort trace-time hardware probe (never raises)."""
    vmem_cap = None
    num_tc = 1
    try:
        info = pltpu.get_tpu_info()
        cap = getattr(info, "vmem_capacity_bytes", None)
        if isinstance(cap, int) and cap > 0:
            vmem_cap = cap
        for name in ("num_cores", "core_count", "tensorcore_count", "num_tensorcores"):
            v = getattr(info, name, None)
            if isinstance(v, int) and v > 0:
                num_tc = v
                break
    except Exception:
        pass
    return vmem_cap, num_tc


def _pick_layout(n, trailing):
    """Pick a lane-dense (rows, cols) view of the flat [n * trailing] stream."""
    total = n * trailing
    if trailing % 128 == 0 and 128 <= trailing <= 16384:
        return n, trailing
    # Prefer large multiples of 128 that divide the flat length (unmasked stores).
    c = 8192
    while c >= 128:
        if total % c == 0:
            return total // c, c
        c -= 128
    # Any divisor >= 128 still beats a sub-128 lane width (partial masking only on
    # the trailing lanes of each row instead of on every store).
    for c in range(min(total, 8192), 127, -1):
        if total % c == 0:
            return total // c, c
    # TODO(synk): pathological flat lengths (no divisor >= 128) keep the natural
    # layout; stores on the last dim may lower to masked vst.
    return n, trailing


def _straddle_kernel(x_ref, o_ref, *, mode, split_row, split_col):
    # Single block containing the mask 0 -> 1 transition.  Row/col comparison
    # (not a flat index) avoids int32 overflow and a per-element i32 multiply.
    x = x_ref[...]
    ten = jnp.asarray(10, x.dtype)
    r = jax.lax.broadcasted_iota(jnp.int32, x.shape, 0)
    c = jax.lax.broadcasted_iota(jnp.int32, x.shape, 1)
    adv = (r > split_row) | ((r == split_row) & (c >= split_col))
    if mode == "2n":
        o_ref[...] = x + jnp.where(adv, ten, jnp.asarray(0, x.dtype))
    else:  # 'null'
        o_ref[...] = jnp.where(adv, ten, x)


def _add10_kernel(x_ref, o_ref):
    # '2n' hot loop: branch-free streaming add.
    o_ref[...] = x_ref[...] + jnp.asarray(10, o_ref.dtype)


def _fill10_kernel(x_ref, o_ref):
    # 'null' hot loop: pure write stream.  x_ref is only the aliased operand that
    # preserves the untouched prefix; its constant block index (a block this call
    # never writes) means the pipeline fetches it once and it is never read.
    del x_ref
    o_ref[...] = jnp.full(o_ref.shape, 10, o_ref.dtype)


def adversarial_label_transform(x, *, mode: str, adv_rate: float,
                                target_block_bytes=None):
    """Pallas implementation of AdversarialLabelTransform.forward."""
    assert mode in ("normal", "2n", "null")
    n = x.shape[0]
    split_idx = int(max(1, (1.0 - adv_rate) * n))

    # Identity fast paths: no pallas_call, no HBM traffic.
    if mode == "normal" or split_idx >= n:
        return x

    trailing = int(math.prod(x.shape[1:]))  # 1 for rank-1 label vectors
    rows, cols = _pick_layout(n, trailing)
    x2 = x.reshape(rows, cols)

    itemsize = x.dtype.itemsize
    sublane = max(8, 32 // itemsize)        # 8 (f32/i32), 16 (bf16), 32 (i8/fp8)
    row_bytes = cols * itemsize
    split_flat = split_idx * trailing       # python int: no i32 overflow risk

    vmem_cap, num_tc = _query_tpu()
    # Scoped-VMEM budget: 48 MiB (or 3/4 of physical) is safe on every generation
    # (v5e/v6e 128 MiB physical, v7x 64 MiB) and above every default scoped limit.
    vmem_limit = min(48 * _MIB, (vmem_cap * 3) // 4) if vmem_cap else 32 * _MIB
    if target_block_bytes is None:
        # Worst-case live footprint is 2 bufs x (in + out) x block = 4 x block.
        target_block_bytes = max(2 * _MIB, min(8 * _MIB, vmem_limit // 6))

    rows_fit = max(1, target_block_bytes // row_bytes)
    if rows_fit >= rows:
        row_block = rows                    # single full-extent block
    else:
        row_block = max(sublane, (rows_fit // sublane) * sublane)

    def _partition(rb):
        be = rb * cols
        sb = split_flat // be               # first block touching mask == 1
        straddle = (split_flat % be) != 0   # does that block mix mask 0 and 1?
        ff = sb + (1 if straddle else 0)    # first fully-adversarial block
        nf = pl.cdiv(rows, rb) - ff         # number of fully-adversarial blocks
        return be, sb, straddle, ff, nf

    # Only multi-TensorCore chips (v7x) benefit from splitting the streaming suffix
    # across >= num_tc grid steps; on single-TC v5e/v6e smaller blocks just add
    # ~0.35 us/step of pipeline overhead.
    if num_tc > 1:
        while _partition(row_block)[4] < num_tc and row_block > sublane:
            new_rb = max(sublane, ((row_block // 2) // sublane) * sublane)
            if new_rb >= row_block:
                break
            row_block = new_rb

    block_elems, start_block, has_straddle, first_full, num_full = _partition(row_block)
    block_bytes = block_elems * itemsize

    y = x2  # aliased through both calls; prefix blocks are never DMA'd

    if has_straddle:
        split_row = split_flat // cols - start_block * row_block
        split_col = split_flat % cols
        kern = functools.partial(_straddle_kernel, mode=mode,
                                 split_row=split_row, split_col=split_col)
        y = pl.pallas_call(
            kern,
            out_shape=jax.ShapeDtypeStruct((rows, cols), x.dtype),
            grid_spec=pl.GridSpec(
                grid=(1,),
                in_specs=[pl.BlockSpec((row_block, cols),
                                       lambda i: (start_block, 0))],
                out_specs=pl.BlockSpec((row_block, cols),
                                       lambda i: (start_block, 0)),
            ),
            input_output_aliases={0: 0},
            compiler_params=pltpu.CompilerParams(
                dimension_semantics=("arbitrary",),
                vmem_limit_bytes=vmem_limit),
            cost_estimate=pl.CostEstimate(
                flops=block_elems, transcendentals=0,
                bytes_accessed=2 * block_bytes),
        )(y)

    if num_full > 0:
        suffix_elems = (rows - first_full * row_block) * cols
        suffix_bytes = suffix_elems * itemsize
        # first_full >= 1 always (split_flat > 0), so first_full - 1 is a block
        # this call never writes: the constant 'null' input index never overlaps
        # an in-flight output write, even under megacore sharding.
        const_block = first_full - 1
        if mode == "2n":
            kern = _add10_kernel
            in_map = lambda i: (i + first_full, 0)
            cost = pl.CostEstimate(flops=suffix_elems, transcendentals=0,
                                   bytes_accessed=2 * suffix_bytes)
        else:  # 'null': pure write stream; constant input index -> single fetch
            kern = _fill10_kernel
            in_map = lambda i: (const_block, 0)
            cost = pl.CostEstimate(flops=0, transcendentals=0,
                                   bytes_accessed=suffix_bytes + block_bytes)
        y = pl.pallas_call(
            kern,
            out_shape=jax.ShapeDtypeStruct((rows, cols), x.dtype),
            grid_spec=pl.GridSpec(
                grid=(num_full,),
                in_specs=[pl.BlockSpec((row_block, cols), in_map)],
                out_specs=pl.BlockSpec((row_block, cols),
                                       lambda i: (i + first_full, 0)),
            ),
            input_output_aliases={0: 0},
            compiler_params=pltpu.CompilerParams(
                dimension_semantics=("parallel",),
                vmem_limit_bytes=vmem_limit),
            cost_estimate=cost,
        )(y)

    return y.reshape(x.shape)


def _reference(x, mode, adv_rate):
    n = x.shape[0]
    idx = int(max(1, (1.0 - adv_rate) * n))
    if mode == "normal":
        return x
    if idx >= n:
        mask = jnp.zeros_like(x)
    else:
        r = jnp.arange(n).reshape((-1,) + (1,) * (x.ndim - 1))
        mask = jnp.broadcast_to(r >= idx, x.shape).astype(x.dtype)
    if mode == "2n":
        return x + mask * 10
    return x * (1 - mask) + mask * 10


if __name__ == "__main__":
    key = jax.random.PRNGKey(0)
    k1, k2, k3, k4, k5, k6 = jax.random.split(key, 6)
    cases = [
        ("x_2d_wide", jax.random.normal(k1, (64, 128), jnp.float32), None),
        ("x_2d_narrow", jax.random.normal(k2, (64, 16), jnp.float32), None),
        ("x_1d", jax.random.normal(k3, (256,), jnp.float32), None),
        ("x_3d", jax.random.normal(k4, (32, 8, 8), jnp.float32), None),
        # Small block size to exercise the multi-block suffix grids on small arrays.
        ("x_multiblock", jax.random.normal(k5, (512, 128), jnp.float32), 64 * 1024),
        ("x_bf16", jax.random.normal(k6, (512, 256), jnp.float32).astype(jnp.bfloat16),
         64 * 1024),
    ]

    ok = True
    for _, x, tbb in cases:
        for mode in ("normal", "2n", "null"):
            for adv_rate in (0.25, 0.7, 0.0):  # 0.0 exercises the idx == N identity
                ref = _reference(x, mode, adv_rate)
                out = adversarial_label_transform(
                    x, mode=mode, adv_rate=adv_rate, target_block_bytes=tbb)
                out = jax.block_until_ready(out)
                if not bool(jnp.allclose(out.astype(jnp.float32),
                                         ref.astype(jnp.float32),
                                         atol=1e-6, rtol=1e-6)):
                    ok = False

    print("KERNEL_OK" if ok else "MISMATCH")
</pallas_src>

<mosaic_0001>
module attributes {stable_mosaic.version = 11 : i64} {
  func.func @_straddle_kernel(%arg0: i32, %arg1: memref<64x128xf32, #tpu.memory_space<vmem>>, %arg2: memref<64x128xf32, #tpu.memory_space<vmem>>) attributes {dimension_semantics = [#tpu.dimension_semantics<arbitrary>], iteration_bounds = array<i64: 1>, scalar_prefetch = 0 : i64, scratch_operands = 0 : i64, tpu.core_type = #tpu.core_type<tc>, window_params = [{pipeline_mode = #tpu.pipeline_mode<synchronous>, transform_indices = @transform_0, window_bounds = array<i64: 64, 128>}, {pipeline_mode = #tpu.pipeline_mode<synchronous>, transform_indices = @transform_1, window_bounds = array<i64: 64, 128>}]} {
    %c0 = arith.constant 0 : index
    %c0_0 = arith.constant 0 : index
    %0 = vector.load %arg1[%c0, %c0_0] : memref<64x128xf32, #tpu.memory_space<vmem>>, vector<64x128xf32>
    %1 = tpu.iota {dimensions = array<i32: 0>} : vector<64x128xi32>
    %2 = tpu.iota {dimensions = array<i32: 1>} : vector<64x128xi32>
    %c48_i32 = arith.constant 48 : i32
    %3 = vector.broadcast %c48_i32 : i32 to vector<64x128xi32>
    %4 = arith.cmpi sgt, %1, %3 : vector<64x128xi32>
    %c48_i32_1 = arith.constant 48 : i32
    %5 = vector.broadcast %c48_i32_1 : i32 to vector<64x128xi32>
    %6 = arith.cmpi eq, %1, %5 : vector<64x128xi32>
    %c0_i32 = arith.constant 0 : i32
    %7 = vector.broadcast %c0_i32 : i32 to vector<64x128xi32>
    %8 = arith.cmpi sge, %2, %7 : vector<64x128xi32>
    %9 = arith.andi %6, %8 : vector<64x128xi1>
    %10 = arith.ori %4, %9 : vector<64x128xi1>
    %cst = arith.constant 1.000000e+01 : f32
    %cst_2 = arith.constant 0.000000e+00 : f32
    %11 = vector.broadcast %cst : f32 to vector<64x128xf32>
    %12 = vector.broadcast %cst_2 : f32 to vector<64x128xf32>
    %13 = arith.select %10, %11, %12 : vector<64x128xi1>, vector<64x128xf32>
    %14 = arith.addf %0, %13 : vector<64x128xf32>
    %c0_3 = arith.constant 0 : index
    %c0_4 = arith.constant 0 : index
    %15 = vector.load %arg2[%c0_3, %c0_4] : memref<64x128xf32, #tpu.memory_space<vmem>>, vector<64x128xf32>
    tpu.vector_store %arg2[%c0_3, %c0_4], %14 {strides = array<i32>} : memref<64x128xf32, #tpu.memory_space<vmem>>, vector<64x128xf32>,
    return
  }
  func.func @transform_0(%arg0: i32) -> (i32, i32) {
    %c0_i32 = arith.constant 0 : i32
    %c0_i32_0 = arith.constant 0 : i32
    %c0_i32_1 = arith.constant 0 : i32
    return %c0_i32, %c0_i32_0 : i32, i32
  }
  func.func @transform_1(%arg0: i32) -> (i32, i32) {
    %c0_i32 = arith.constant 0 : i32
    %c0_i32_0 = arith.constant 0 : i32
    %c0_i32_1 = arith.constant 0 : i32
    return %c0_i32, %c0_i32_0 : i32, i32
  }
}

</mosaic_0001>

<bundles_post_ra>
// kernel: tpu_custom_call.1
= control target key start
LH: loop header
LB: loop body
LE: loop exit
PB: predicated region body
PF: predicated region fallthrough
CT: control target
= control target key end

     0   :  { %6 = vsyncpa [#allocation3], 0  ;;  %s216_s0 = inlined_call_operand.hbm [shape: f32[64,128], index: 0, kind: input, shape index: {}, may-alias: {0,1}]   ;;  %s217_s1 = inlined_call_operand.hbm [shape: f32[64,128], index: 1, kind: output, shape index: {}, may-alias: {0,1}]  }
   0x1   :  { %7 = vsyncpa [#allocation4], 0  ;;  %s169_s6 = smov [#allocation2]   ;;  %s121_s10 = scalar_lea.hbm %s216_s0, 1024 }
   0x2   :  { %s13_s7 = sshll.u32 %s169_s6, 4  ;;  %p122_p0 = scmp.ne.s32.totalorder %s216_s0, %s121_s10  ;;  %s14_s7 = int_to_ptr.vmem [resolvable:$true] %s13_s7 }
   0x3   :  { %p125_p1 = scmp.lt.u32.totalorder %s121_s10, %s216_s0 }
   0x5   :  { %p127_p2 = pnand %p125_p1, %p122_p0 }
   0x7   :  { %130 = shalt.err (!%p127_p2)
}
   0x8   :  { %s131_s15 = scalar_lea.vmem %s14_s7, 1024  ;;  %p136_p4 = scmp.lt.s32.totalorder %s14_s7, %s14_s7 }
   0x9   :  { %p132_p3 = scmp.ne.s32.totalorder %s14_s7, %s131_s15  ;;  %p137_p5 = scmp.lt.s32.totalorder %s131_s15, %s131_s15 }
   0xb   :  { %p138_p6 = por %p137_p5, %p136_p4 }
   0xd   :  { %p139_p7 = pnand %p138_p6, %p132_p3 }
   0xf   :  { %142 = shalt.err (!%p139_p7)
}
  0x10   :  { %s170_s16 = smov 128   ;;  %s171_s17 = smov 8  }
  0x11   :  { %19 = dma.hbm_to_vmem [thread:$0]  %s216_s0, 1024, %s14_s7, [#allocation3], %s170_s16, %s170_s16, %s171_s17  }
  0x12   :  { %165 = dma.done.wait [#allocation3], 1024  }
  0x13   :  { %166 = vsyncadd [#allocation3], 4294966272  ;;  %v31_v0 = vlaneseq  ;;  %v23_v3 = vld [vmem:[#allocation2] sm:$0xff]  ;;  %v24_v4 = vld [vmem:[#allocation2 + $0x8] sm:$0xff]  ;;  %s172_s20 = smov [#allocation5]   ;;  %v173_v11 = vmov 0.0  }
  0x14   :  { %v25_v5 = vld [vmem:[#allocation2 + $0x10] sm:$0xff]  ;;  %91 = vst [vmem:[#allocation5] sm:$0xff] %v23_v3  ;;  %92 = vst [vmem:[#allocation5 + $0x8] sm:$0xff] %v24_v4  ;;  %v26_v6 = vld [vmem:[#allocation2 + $0x18] sm:$0xff]  ;;  %s104_s21 = sshll.u32 %s172_s20, 4  ;;  %s105_s21 = int_to_ptr.vmem [resolvable:$true] %s104_s21 }
  0x15   :  { %v32_v1 = vshrl.u32 %v31_v0, 7  ;;  %93 = vst [vmem:[#allocation5 + $0x10] sm:$0xff] %v25_v5  ;;  %v27_v7 = vld [vmem:[#allocation2 + $0x20] sm:$0xff]  ;;  %v28_v8 = vld [vmem:[#allocation2 + $0x28] sm:$0xff]  ;;  %94 = vst [vmem:[#allocation5 + $0x18] sm:$0xff] %v26_v6  ;;  %s143_s0 = scalar_lea.vmem %s105_s21, 1024  ;;  %p148_p9 = scmp.lt.s32.totalorder %s105_s21, %s105_s21 }
  0x16   :  { %95 = vst [vmem:[#allocation5 + $0x20] sm:$0xff] %v27_v7  ;;  %96 = vst [vmem:[#allocation5 + $0x28] sm:$0xff] %v28_v8  ;;  %v29_v9 = vld [vmem:[#allocation2 + $0x30] sm:$0xff]  ;;  %v30_v10 = vld [vmem:[#allocation2 + $0x38] sm:$0xff]  ;;  %p144_p8 = scmp.ne.s32.totalorder %s105_s21, %s143_s0  ;;  %p149_p10 = scmp.lt.s32.totalorder %s143_s0, %s143_s0 }
  0x17   :  { %v38_v2 = vadd.s32 48, %v32_v1  ;;  %v90_v13 = vadd.f32 10.0, %v30_v10 }
  0x18   :  { %p150_p11 = por %p149_p10, %p148_p9 }
  0x19   :  { %vm48_vm0 = vcmp.gt.s32.totalorder %v38_v2, 48  ;;  %vm56_vm1 = vcmp.eq.s32.totalorder %v38_v2, 48  ;;  %98 = vst [vmem:[#allocation5 + $0x38] sm:$0xff] %v90_v13 }
  0x1a   :  { %vm73_vm2 = vmor %vm48_vm0, %vm56_vm1  ;;  %p151_p12 = pnand %p150_p11, %p144_p8 }
  0x1b   :  { %v81_v12 = vsel %vm73_vm2, 10.0, %v173_v11 }
  0x1c   :  { %v89_v14 = vadd.f32 %v81_v12, %v29_v9 }
  0x1e   :  { %97 = vst [vmem:[#allocation5 + $0x30] sm:$0xff] %v89_v14 }
  0x1f   :  { %154 = shalt.err (!%p151_p12)
}
  0x20   :  { %s155_s24 = scalar_lea.hbm %s217_s1, 1024 }
  0x21   :  { %p156_p13 = scmp.ne.s32.totalorder %s217_s1, %s155_s24  ;;  %p159_p0 = scmp.lt.u32.totalorder %s155_s24, %s217_s1 }
  0x23   :  { %p161_p1 = pnand %p159_p0, %p156_p13 }
  0x25   :  { %164 = shalt.err (!%p161_p1)
}
  0x26   :  { %110 = dma.vmem_to_hbm [thread:$0]  %s105_s21, 1024, %s217_s1, [#allocation4], %s170_s16, %s170_s16, %s171_s17  }
  0x27   :  { %167 = dma.done.wait [#allocation4], 1024  }
  0x28   :  { %168 = vsyncadd [#allocation4], 4294966272 }
  0x29   :  { %114 = vsyncpa [#allocation3], 1 }
  0x2a   :  { %115 = vsyncpa [#allocation4], 1 }

</bundles_post_ra>
